<compile_context>
chip_gen: v7x
topology: tpu7x:2x2x1
jax: 0.10.0
libtpu: 0.0.40
codegen_flags: <defaults>
</compile_context>

<pallas_src>
import jax
import jax.numpy as jnp
from jax.experimental import pallas as pl
from jax.experimental.pallas import tpu as pltpu  # noqa: F401  (TPU backend)


# ----------------------------------------------------------------------------
# Fused GRU encoder + forecast-head kernel (single invocation, no grid)
# ----------------------------------------------------------------------------
def _apc_fused_kernel(x_ref, wih_ref, whh_ref, bg_ref, bhn_ref,
                      w1_ref, b1_ref, w2_ref, b2_ref,
                      out_ref, pred_ref):
    B, L, H = out_ref.shape

    # ---- hoisted, non-recurrent input projection for all timesteps --------
    # (L*B, C) @ (C, 3H) + folded bias  -> one MXU matmul instead of L tiny ones.
    gi_all = jnp.dot(x_ref[...], wih_ref[...],
                     preferred_element_type=jnp.float32) + bg_ref[...]

    w_hh = whh_ref[...]          # (H, 3H), already transposed at init
    b_hn = bhn_ref[...]          # (1, H)

    # ---- sequential GRU recurrence (fully unrolled; static indices) -------
    # PyTorch gate order [r | z | n]; h = (1-z)*n + z*h_prev.
    h = jnp.zeros((B, H), dtype=jnp.float32)
    for t in range(L):
        gi = gi_all[t * B:(t + 1) * B, :]                       # (B, 3H)
        gh = jnp.dot(h, w_hh, preferred_element_type=jnp.float32)
        r = jax.nn.sigmoid(gi[:, :H] + gh[:, :H])
        z = jax.nn.sigmoid(gi[:, H:2 * H] + gh[:, H:2 * H])
        n = jnp.tanh(gi[:, 2 * H:] + r * (gh[:, 2 * H:] + b_hn))
        h = (1.0 - z) * n + z * h
        out_ref[:, t, :] = h.astype(out_ref.dtype)              # batch-first

    # ---- fused forecast head on the final hidden state ---------------------
    hid = jnp.dot(h, w1_ref[...], preferred_element_type=jnp.float32) + b1_ref[...]
    hid = jnp.maximum(hid, 0.0)
    pred = jnp.dot(hid, w2_ref[...], preferred_element_type=jnp.float32) + b2_ref[...]
    pred_ref[...] = pred.astype(pred_ref.dtype)


def _full_spec(shape):
    return pl.BlockSpec(shape, lambda: (0,) * len(shape))


def apc_forward_fused(x_bcl, w_ih, w_hh, b_gate, b_hn, w1, b1, w2, b2):
    """x_bcl: (B, C, L).  Returns (out (B, L, H), pred (B, C_out))."""
    B, C, L = x_bcl.shape
    H = w_hh.shape[0]
    H3 = 3 * H
    P = w1.shape[1]
    Co = w2.shape[1]

    # Time-major + flattened so the input projection is one clean matmul.
    x_flat = jnp.transpose(x_bcl, (2, 0, 1)).reshape(L * B, C).astype(jnp.float32)

    return pl.pallas_call(
        _apc_fused_kernel,
        out_shape=(jax.ShapeDtypeStruct((B, L, H), jnp.float32),
                   jax.ShapeDtypeStruct((B, Co), jnp.float32)),
        in_specs=[
            _full_spec((L * B, C)),    # x (time-major, flattened)
            _full_spec((C, H3)),       # W_ih (pre-transposed)
            _full_spec((H, H3)),       # W_hh (pre-transposed)
            _full_spec((1, H3)),       # folded gate bias
            _full_spec((1, H)),        # b_hn
            _full_spec((H, P)),        # head W1
            _full_spec((1, P)),        # head b1
            _full_spec((P, Co)),       # head W2
            _full_spec((1, Co)),       # head b2
        ],
        out_specs=(_full_spec((B, L, H)), _full_spec((B, Co))),
    )(x_flat, w_ih, w_hh, b_gate, b_hn, w1, b1, w2, b2)


# ----------------------------------------------------------------------------
# Standalone forecast head kernel (generic APC.forecast(c_t, idx) API)
# ----------------------------------------------------------------------------
def _forecast_kernel(c_ref, w1_ref, b1_ref, w2_ref, b2_ref, out_ref):
    hid = jnp.dot(c_ref[...].astype(jnp.float32), w1_ref[...],
                  preferred_element_type=jnp.float32) + b1_ref[...]
    hid = jnp.maximum(hid, 0.0)
    out = jnp.dot(hid, w2_ref[...], preferred_element_type=jnp.float32) + b2_ref[...]
    out_ref[...] = out.astype(out_ref.dtype)


def forecast_head(c_t, w1, b1, w2, b2):
    """c_t: (N, H); w1: (H, P); w2: (P, C_out).  Returns (N, C_out)."""
    N, H = c_t.shape
    P = w1.shape[1]
    Co = w2.shape[1]
    return pl.pallas_call(
        _forecast_kernel,
        out_shape=jax.ShapeDtypeStruct((N, Co), jnp.float32),
        in_specs=[_full_spec((N, H)), _full_spec((H, P)), _full_spec((1, P)),
                  _full_spec((P, Co)), _full_spec((1, Co))],
        out_specs=_full_spec((N, Co)),
    )(c_t, w1, b1, w2, b2)


# ----------------------------------------------------------------------------
# APC module (JAX parameter container + Pallas hot paths)
# ----------------------------------------------------------------------------
class APCPallas:
    def __init__(self, in_channels_enc=4, h_size=32, forecast_pred_hid_apc=64,
                 n_pred_steps_apc=(3,), seed=0):
        self.in_channels_enc = in_channels_enc
        self.h_size = h_size
        self.forecast_pred_hid = forecast_pred_hid_apc
        self.n_pred_steps_apc = n_pred_steps_apc

        key = jax.random.PRNGKey(seed)
        ks = jax.random.split(key, 4 + 4 * len(n_pred_steps_apc))

        def uni(k, shape, fan_in):
            bound = 1.0 / jnp.sqrt(jnp.float32(fan_in))
            return jax.random.uniform(k, shape, jnp.float32, -bound, bound)

        C, H = in_channels_enc, h_size
        # GRU weights stored pre-transposed (matmul-ready layout).
        self.w_ih = uni(ks[0], (C, 3 * H), H)          # (C, 3H)
        self.w_hh = uni(ks[1], (H, 3 * H), H)          # (H, 3H)
        b_ih = uni(ks[2], (3 * H,), H)
        b_hh = uni(ks[3], (3 * H,), H)
        # Fold b_hh for the r/z gates into the input-projection bias; keep the
        # n-gate hidden bias separate (it lives inside r * (W_hn h + b_hn)).
        self.b_gate = (b_ih + jnp.concatenate(
            [b_hh[:2 * H], jnp.zeros((H,), jnp.float32)])).reshape(1, 3 * H)
        self.b_hn = b_hh[2 * H:].reshape(1, H)

        # Forecast heads: Linear(H, P) -> ReLU -> Linear(P, C)
        P = forecast_pred_hid_apc
        self.heads = []
        kidx = 4
        for _ in n_pred_steps_apc:
            w1 = uni(ks[kidx + 0], (H, P), H)
            b1 = uni(ks[kidx + 1], (1, P), H)
            w2 = uni(ks[kidx + 2], (P, C), P)
            b2 = uni(ks[kidx + 3], (1, C), P)
            self.heads.append((w1, b1, w2, b2))
            kidx += 4

    def forward_and_forecast(self, x_bcl, idx=0):
        """x_bcl: (B, C, L) -> (encoder out (B, L, H), head prediction (B, C))."""
        w1, b1, w2, b2 = self.heads[idx]
        return apc_forward_fused(x_bcl, self.w_ih, self.w_hh, self.b_gate,
                                 self.b_hn, w1, b1, w2, b2)

    def forward(self, x_bcl):
        """x_bcl: (B, C, L) like PyTorch.  Returns (B, L, H)."""
        out, _ = self.forward_and_forecast(x_bcl, idx=0)
        return out

    def forecast(self, c_t, idx):
        """c_t: (N, H) -> (N, in_channels_enc)."""
        w1, b1, w2, b2 = self.heads[idx]
        return forecast_head(c_t, w1, b1, w2, b2)


if __name__ == "__main__":
    B, C, L, H, P = 2, 4, 8, 32, 64

    key = jax.random.PRNGKey(0)
    x = jax.random.normal(key, (B, C, L), dtype=jnp.float32)

    apc = APCPallas(in_channels_enc=C, h_size=H, forecast_pred_hid_apc=P,
                    n_pred_steps_apc=(3,), seed=0)

    out, pred = apc.forward_and_forecast(x, idx=0)   # fused single kernel
    jax.block_until_ready((out, pred))

    assert out.shape == (B, L, H)
    assert pred.shape == (B, C)

    # Standalone head applied to c_t = out[:, -1, :] must match the fused epilogue.
    pred_ref = apc.forecast(out[:, -1, :], idx=0)
    jax.block_until_ready(pred_ref)
    assert pred_ref.shape == (B, C)
    assert bool(jnp.allclose(pred, pred_ref, atol=1e-4, rtol=1e-4))

    print("KERNEL_OK")
</pallas_src>

<mosaic_0001>
module attributes {stable_mosaic.version = 11 : i64} {
  func.func @_apc_fused_kernel(%arg0: memref<16x4xf32, #tpu.memory_space<vmem>>, %arg1: memref<4x96xf32, #tpu.memory_space<vmem>>, %arg2: memref<32x96xf32, #tpu.memory_space<vmem>>, %arg3: memref<1x96xf32, #tpu.memory_space<vmem>>, %arg4: memref<1x32xf32, #tpu.memory_space<vmem>>, %arg5: memref<32x64xf32, #tpu.memory_space<vmem>>, %arg6: memref<1x64xf32, #tpu.memory_space<vmem>>, %arg7: memref<64x4xf32, #tpu.memory_space<vmem>>, %arg8: memref<1x4xf32, #tpu.memory_space<vmem>>, %arg9: memref<2x8x32xf32, #tpu.memory_space<vmem>>, %arg10: memref<2x4xf32, #tpu.memory_space<vmem>>) attributes {dimension_semantics = [], scalar_prefetch = 0 : i64, scratch_operands = 0 : i64, tpu.core_type = #tpu.core_type<tc>} {
    %c0 = arith.constant 0 : index
    %c0_0 = arith.constant 0 : index
    %0 = vector.load %arg0[%c0, %c0_0] : memref<16x4xf32, #tpu.memory_space<vmem>>, vector<16x4xf32>
    %c0_1 = arith.constant 0 : index
    %c0_2 = arith.constant 0 : index
    %1 = vector.load %arg1[%c0_1, %c0_2] : memref<4x96xf32, #tpu.memory_space<vmem>>, vector<4x96xf32>
    %cst = arith.constant dense<0.000000e+00> : vector<16x96xf32>
    %2 = tpu.matmul %0, %1, %cst {dimension_numbers = #tpu.dot_dimension_numbers<[1], [0], [0], [1], [0, 0, 1, 1], [], []>} : vector<16x4xf32>, vector<4x96xf32>, vector<16x96xf32> -> vector<16x96xf32>
    %c0_3 = arith.constant 0 : index
    %c0_4 = arith.constant 0 : index
    %3 = vector.load %arg3[%c0_3, %c0_4] : memref<1x96xf32, #tpu.memory_space<vmem>>, vector<1x96xf32>
    %4 = vector.broadcast %3 : vector<1x96xf32> to vector<16x96xf32>
    %5 = arith.addf %2, %4 : vector<16x96xf32>
    %c0_5 = arith.constant 0 : index
    %c0_6 = arith.constant 0 : index
    %6 = vector.load %arg2[%c0_5, %c0_6] : memref<32x96xf32, #tpu.memory_space<vmem>>, vector<32x96xf32>
    %c0_7 = arith.constant 0 : index
    %c0_8 = arith.constant 0 : index
    %7 = vector.load %arg4[%c0_7, %c0_8] : memref<1x32xf32, #tpu.memory_space<vmem>>, vector<1x32xf32>
    %cst_9 = arith.constant 0.000000e+00 : f32
    %8 = vector.broadcast %cst_9 : f32 to vector<2x32xf32>
    %9 = vector.extract_strided_slice %5 {offsets = [0, 0], sizes = [2, 96], strides = [1, 1]} : vector<16x96xf32> to vector<2x96xf32>
    %cst_10 = arith.constant dense<0.000000e+00> : vector<2x96xf32>
    %10 = tpu.matmul %8, %6, %cst_10 {dimension_numbers = #tpu.dot_dimension_numbers<[1], [0], [0], [1], [0, 0, 1, 1], [], []>} : vector<2x32xf32>, vector<32x96xf32>, vector<2x96xf32> -> vector<2x96xf32>
    %11 = vector.extract_strided_slice %9 {offsets = [0, 0], sizes = [2, 32], strides = [1, 1]} : vector<2x96xf32> to vector<2x32xf32>
    %12 = vector.extract_strided_slice %10 {offsets = [0, 0], sizes = [2, 32], strides = [1, 1]} : vector<2x96xf32> to vector<2x32xf32>
    %13 = arith.addf %11, %12 : vector<2x32xf32>
    %14 = arith.negf %13 : vector<2x32xf32>
    %15 = math.exp %14 : vector<2x32xf32>
    %cst_11 = arith.constant 1.000000e+00 : f32
    %16 = vector.broadcast %cst_11 : f32 to vector<2x32xf32>
    %17 = arith.addf %16, %15 : vector<2x32xf32>
    %18 = arith.divf %16, %17 : vector<2x32xf32>
    %19 = vector.extract_strided_slice %9 {offsets = [0, 32], sizes = [2, 32], strides = [1, 1]} : vector<2x96xf32> to vector<2x32xf32>
    %20 = vector.extract_strided_slice %10 {offsets = [0, 32], sizes = [2, 32], strides = [1, 1]} : vector<2x96xf32> to vector<2x32xf32>
    %21 = arith.addf %19, %20 : vector<2x32xf32>
    %22 = arith.negf %21 : vector<2x32xf32>
    %23 = math.exp %22 : vector<2x32xf32>
    %cst_12 = arith.constant 1.000000e+00 : f32
    %24 = vector.broadcast %cst_12 : f32 to vector<2x32xf32>
    %25 = arith.addf %24, %23 : vector<2x32xf32>
    %26 = arith.divf %24, %25 : vector<2x32xf32>
    %27 = vector.extract_strided_slice %9 {offsets = [0, 64], sizes = [2, 32], strides = [1, 1]} : vector<2x96xf32> to vector<2x32xf32>
    %28 = vector.extract_strided_slice %10 {offsets = [0, 64], sizes = [2, 32], strides = [1, 1]} : vector<2x96xf32> to vector<2x32xf32>
    %29 = vector.broadcast %7 : vector<1x32xf32> to vector<2x32xf32>
    %30 = arith.addf %28, %29 : vector<2x32xf32>
    %31 = arith.mulf %18, %30 : vector<2x32xf32>
    %32 = arith.addf %27, %31 : vector<2x32xf32>
    %33 = math.tanh %32 : vector<2x32xf32>
    %cst_13 = arith.constant 1.000000e+00 : f32
    %34 = vector.broadcast %cst_13 : f32 to vector<2x32xf32>
    %35 = arith.subf %34, %26 : vector<2x32xf32>
    %36 = arith.mulf %35, %33 : vector<2x32xf32>
    %37 = arith.mulf %26, %8 : vector<2x32xf32>
    %38 = arith.addf %36, %37 : vector<2x32xf32>
    %c0_14 = arith.constant 0 : index
    %c0_15 = arith.constant 0 : index
    %c0_16 = arith.constant 0 : index
    %39 = vector.load %arg9[%c0_14, %c0_15, %c0_16] : memref<2x8x32xf32, #tpu.memory_space<vmem>>, vector<2x1x32xf32>
    %40 = vector.shape_cast %39 : vector<2x1x32xf32> to vector<2x32xf32>
    %41 = vector.shape_cast %38 : vector<2x32xf32> to vector<2x1x32xf32>
    tpu.vector_store %arg9[%c0_14, %c0_15, %c0_16], %41 {strides = array<i32>} : memref<2x8x32xf32, #tpu.memory_space<vmem>>, vector<2x1x32xf32>,
    %42 = vector.extract_strided_slice %5 {offsets = [2, 0], sizes = [2, 96], strides = [1, 1]} : vector<16x96xf32> to vector<2x96xf32>
    %cst_17 = arith.constant dense<0.000000e+00> : vector<2x96xf32>
    %43 = tpu.matmul %38, %6, %cst_17 {dimension_numbers = #tpu.dot_dimension_numbers<[1], [0], [0], [1], [0, 0, 1, 1], [], []>} : vector<2x32xf32>, vector<32x96xf32>, vector<2x96xf32> -> vector<2x96xf32>
    %44 = vector.extract_strided_slice %42 {offsets = [0, 0], sizes = [2, 32], strides = [1, 1]} : vector<2x96xf32> to vector<2x32xf32>
    %45 = vector.extract_strided_slice %43 {offsets = [0, 0], sizes = [2, 32], strides = [1, 1]} : vector<2x96xf32> to vector<2x32xf32>
    %46 = arith.addf %44, %45 : vector<2x32xf32>
    %47 = arith.negf %46 : vector<2x32xf32>
    %48 = math.exp %47 : vector<2x32xf32>
    %cst_18 = arith.constant 1.000000e+00 : f32
    %49 = vector.broadcast %cst_18 : f32 to vector<2x32xf32>
    %50 = arith.addf %49, %48 : vector<2x32xf32>
    %51 = arith.divf %49, %50 : vector<2x32xf32>
    %52 = vector.extract_strided_slice %42 {offsets = [0, 32], sizes = [2, 32], strides = [1, 1]} : vector<2x96xf32> to vector<2x32xf32>
    %53 = vector.extract_strided_slice %43 {offsets = [0, 32], sizes = [2, 32], strides = [1, 1]} : vector<2x96xf32> to vector<2x32xf32>
    %54 = arith.addf %52, %53 : vector<2x32xf32>
    %55 = arith.negf %54 : vector<2x32xf32>
    %56 = math.exp %55 : vector<2x32xf32>
    %cst_19 = arith.constant 1.000000e+00 : f32
    %57 = vector.broadcast %cst_19 : f32 to vector<2x32xf32>
    %58 = arith.addf %57, %56 : vector<2x32xf32>
    %59 = arith.divf %57, %58 : vector<2x32xf32>
    %60 = vector.extract_strided_slice %42 {offsets = [0, 64], sizes = [2, 32], strides = [1, 1]} : vector<2x96xf32> to vector<2x32xf32>
    %61 = vector.extract_strided_slice %43 {offsets = [0, 64], sizes = [2, 32], strides = [1, 1]} : vector<2x96xf32> to vector<2x32xf32>
    %62 = vector.broadcast %7 : vector<1x32xf32> to vector<2x32xf32>
    %63 = arith.addf %61, %62 : vector<2x32xf32>
    %64 = arith.mulf %51, %63 : vector<2x32xf32>
    %65 = arith.addf %60, %64 : vector<2x32xf32>
    %66 = math.tanh %65 : vector<2x32xf32>
    %cst_20 = arith.constant 1.000000e+00 : f32
    %67 = vector.broadcast %cst_20 : f32 to vector<2x32xf32>
    %68 = arith.subf %67, %59 : vector<2x32xf32>
    %69 = arith.mulf %68, %66 : vector<2x32xf32>
    %70 = arith.mulf %59, %38 : vector<2x32xf32>
    %71 = arith.addf %69, %70 : vector<2x32xf32>
    %c0_21 = arith.constant 0 : index
    %c1 = arith.constant 1 : index
    %c0_22 = arith.constant 0 : index
    %72 = vector.load %arg9[%c0_21, %c1, %c0_22] : memref<2x8x32xf32, #tpu.memory_space<vmem>>, vector<2x1x32xf32>
    %73 = vector.shape_cast %72 : vector<2x1x32xf32> to vector<2x32xf32>
    %74 = vector.shape_cast %71 : vector<2x32xf32> to vector<2x1x32xf32>
    tpu.vector_store %arg9[%c0_21, %c1, %c0_22], %74 {strides = array<i32>} : memref<2x8x32xf32, #tpu.memory_space<vmem>>, vector<2x1x32xf32>,
    %75 = vector.extract_strided_slice %5 {offsets = [4, 0], sizes = [2, 96], strides = [1, 1]} : vector<16x96xf32> to vector<2x96xf32>
    %cst_23 = arith.constant dense<0.000000e+00> : vector<2x96xf32>
    %76 = tpu.matmul %71, %6, %cst_23 {dimension_numbers = #tpu.dot_dimension_numbers<[1], [0], [0], [1], [0, 0, 1, 1], [], []>} : vector<2x32xf32>, vector<32x96xf32>, vector<2x96xf32> -> vector<2x96xf32>
    %77 = vector.extract_strided_slice %75 {offsets = [0, 0], sizes = [2, 32], strides = [1, 1]} : vector<2x96xf32> to vector<2x32xf32>
    %78 = vector.extract_strided_slice %76 {offsets = [0, 0], sizes = [2, 32], strides = [1, 1]} : vector<2x96xf32> to vector<2x32xf32>
    %79 = arith.addf %77, %78 : vector<2x32xf32>
    %80 = arith.negf %79 : vector<2x32xf32>
    %81 = math.exp %80 : vector<2x32xf32>
    %cst_24 = arith.constant 1.000000e+00 : f32
    %82 = vector.broadcast %cst_24 : f32 to vector<2x32xf32>
    %83 = arith.addf %82, %81 : vector<2x32xf32>
    %84 = arith.divf %82, %83 : vector<2x32xf32>
    %85 = vector.extract_strided_slice %75 {offsets = [0, 32], sizes = [2, 32], strides = [1, 1]} : vector<2x96xf32> to vector<2x32xf32>
    %86 = vector.extract_strided_slice %76 {offsets = [0, 32], sizes = [2, 32], strides = [1, 1]} : vector<2x96xf32> to vector<2x32xf32>
    %87 = arith.addf %85, %86 : vector<2x32xf32>
    %88 = arith.negf %87 : vector<2x32xf32>
    %89 = math.exp %88 : vector<2x32xf32>
    %cst_25 = arith.constant 1.000000e+00 : f32
    %90 = vector.broadcast %cst_25 : f32 to vector<2x32xf32>
    %91 = arith.addf %90, %89 : vector<2x32xf32>
    %92 = arith.divf %90, %91 : vector<2x32xf32>
    %93 = vector.extract_strided_slice %75 {offsets = [0, 64], sizes = [2, 32], strides = [1, 1]} : vector<2x96xf32> to vector<2x32xf32>
    %94 = vector.extract_strided_slice %76 {offsets = [0, 64], sizes = [2, 32], strides = [1, 1]} : vector<2x96xf32> to vector<2x32xf32>
    %95 = vector.broadcast %7 : vector<1x32xf32> to vector<2x32xf32>
    %96 = arith.addf %94, %95 : vector<2x32xf32>
    %97 = arith.mulf %84, %96 : vector<2x32xf32>
    %98 = arith.addf %93, %97 : vector<2x32xf32>
    %99 = math.tanh %98 : vector<2x32xf32>
    %cst_26 = arith.constant 1.000000e+00 : f32
    %100 = vector.broadcast %cst_26 : f32 to vector<2x32xf32>
    %101 = arith.subf %100, %92 : vector<2x32xf32>
    %102 = arith.mulf %101, %99 : vector<2x32xf32>
    %103 = arith.mulf %92, %71 : vector<2x32xf32>
    %104 = arith.addf %102, %103 : vector<2x32xf32>
    %c0_27 = arith.constant 0 : index
    %c2 = arith.constant 2 : index
    %c0_28 = arith.constant 0 : index
    %105 = vector.load %arg9[%c0_27, %c2, %c0_28] : memref<2x8x32xf32, #tpu.memory_space<vmem>>, vector<2x1x32xf32>
    %106 = vector.shape_cast %105 : vector<2x1x32xf32> to vector<2x32xf32>
    %107 = vector.shape_cast %104 : vector<2x32xf32> to vector<2x1x32xf32>
    tpu.vector_store %arg9[%c0_27, %c2, %c0_28], %107 {strides = array<i32>} : memref<2x8x32xf32, #tpu.memory_space<vmem>>, vector<2x1x32xf32>,
    %108 = vector.extract_strided_slice %5 {offsets = [6, 0], sizes = [2, 96], strides = [1, 1]} : vector<16x96xf32> to vector<2x96xf32>
    %cst_29 = arith.constant dense<0.000000e+00> : vector<2x96xf32>
    %109 = tpu.matmul %104, %6, %cst_29 {dimension_numbers = #tpu.dot_dimension_numbers<[1], [0], [0], [1], [0, 0, 1, 1], [], []>} : vector<2x32xf32>, vector<32x96xf32>, vector<2x96xf32> -> vector<2x96xf32>
    %110 = vector.extract_strided_slice %108 {offsets = [0, 0], sizes = [2, 32], strides = [1, 1]} : vector<2x96xf32> to vector<2x32xf32>
    %111 = vector.extract_strided_slice %109 {offsets = [0, 0], sizes = [2, 32], strides = [1, 1]} : vector<2x96xf32> to vector<2x32xf32>
    %112 = arith.addf %110, %111 : vector<2x32xf32>
    %113 = arith.negf %112 : vector<2x32xf32>
    %114 = math.exp %113 : vector<2x32xf32>
    %cst_30 = arith.constant 1.000000e+00 : f32
    %115 = vector.broadcast %cst_30 : f32 to vector<2x32xf32>
    %116 = arith.addf %115, %114 : vector<2x32xf32>
    %117 = arith.divf %115, %116 : vector<2x32xf32>
    %118 = vector.extract_strided_slice %108 {offsets = [0, 32], sizes = [2, 32], strides = [1, 1]} : vector<2x96xf32> to vector<2x32xf32>
    %119 = vector.extract_strided_slice %109 {offsets = [0, 32], sizes = [2, 32], strides = [1, 1]} : vector<2x96xf32> to vector<2x32xf32>
    %120 = arith.addf %118, %119 : vector<2x32xf32>
    %121 = arith.negf %120 : vector<2x32xf32>
    %122 = math.exp %121 : vector<2x32xf32>
    %cst_31 = arith.constant 1.000000e+00 : f32
    %123 = vector.broadcast %cst_31 : f32 to vector<2x32xf32>
    %124 = arith.addf %123, %122 : vector<2x32xf32>
    %125 = arith.divf %123, %124 : vector<2x32xf32>
    %126 = vector.extract_strided_slice %108 {offsets = [0, 64], sizes = [2, 32], strides = [1, 1]} : vector<2x96xf32> to vector<2x32xf32>
    %127 = vector.extract_strided_slice %109 {offsets = [0, 64], sizes = [2, 32], strides = [1, 1]} : vector<2x96xf32> to vector<2x32xf32>
    %128 = vector.broadcast %7 : vector<1x32xf32> to vector<2x32xf32>
    %129 = arith.addf %127, %128 : vector<2x32xf32>
    %130 = arith.mulf %117, %129 : vector<2x32xf32>
    %131 = arith.addf %126, %130 : vector<2x32xf32>
    %132 = math.tanh %131 : vector<2x32xf32>
    %cst_32 = arith.constant 1.000000e+00 : f32
    %133 = vector.broadcast %cst_32 : f32 to vector<2x32xf32>
    %134 = arith.subf %133, %125 : vector<2x32xf32>
    %135 = arith.mulf %134, %132 : vector<2x32xf32>
    %136 = arith.mulf %125, %104 : vector<2x32xf32>
    %137 = arith.addf %135, %136 : vector<2x32xf32>
    %c0_33 = arith.constant 0 : index
    %c3 = arith.constant 3 : index
    %c0_34 = arith.constant 0 : index
    %138 = vector.load %arg9[%c0_33, %c3, %c0_34] : memref<2x8x32xf32, #tpu.memory_space<vmem>>, vector<2x1x32xf32>
    %139 = vector.shape_cast %138 : vector<2x1x32xf32> to vector<2x32xf32>
    %140 = vector.shape_cast %137 : vector<2x32xf32> to vector<2x1x32xf32>
    tpu.vector_store %arg9[%c0_33, %c3, %c0_34], %140 {strides = array<i32>} : memref<2x8x32xf32, #tpu.memory_space<vmem>>, vector<2x1x32xf32>,
    %141 = vector.extract_strided_slice %5 {offsets = [8, 0], sizes = [2, 96], strides = [1, 1]} : vector<16x96xf32> to vector<2x96xf32>
    %cst_35 = arith.constant dense<0.000000e+00> : vector<2x96xf32>
    %142 = tpu.matmul %137, %6, %cst_35 {dimension_numbers = #tpu.dot_dimension_numbers<[1], [0], [0], [1], [0, 0, 1, 1], [], []>} : vector<2x32xf32>, vector<32x96xf32>, vector<2x96xf32> -> vector<2x96xf32>
    %143 = vector.extract_strided_slice %141 {offsets = [0, 0], sizes = [2, 32], strides = [1, 1]} : vector<2x96xf32> to vector<2x32xf32>
    %144 = vector.extract_strided_slice %142 {offsets = [0, 0], sizes = [2, 32], strides = [1, 1]} : vector<2x96xf32> to vector<2x32xf32>
    %145 = arith.addf %143, %144 : vector<2x32xf32>
    %146 = arith.negf %145 : vector<2x32xf32>
    %147 = math.exp %146 : vector<2x32xf32>
    %cst_36 = arith.constant 1.000000e+00 : f32
    %148 = vector.broadcast %cst_36 : f32 to vector<2x32xf32>
    %149 = arith.addf %148, %147 : vector<2x32xf32>
    %150 = arith.divf %148, %149 : vector<2x32xf32>
    %151 = vector.extract_strided_slice %141 {offsets = [0, 32], sizes = [2, 32], strides = [1, 1]} : vector<2x96xf32> to vector<2x32xf32>
    %152 = vector.extract_strided_slice %142 {offsets = [0, 32], sizes = [2, 32], strides = [1, 1]} : vector<2x96xf32> to vector<2x32xf32>
    %153 = arith.addf %151, %152 : vector<2x32xf32>
    %154 = arith.negf %153 : vector<2x32xf32>
    %155 = math.exp %154 : vector<2x32xf32>
    %cst_37 = arith.constant 1.000000e+00 : f32
    %156 = vector.broadcast %cst_37 : f32 to vector<2x32xf32>
    %157 = arith.addf %156, %155 : vector<2x32xf32>
    %158 = arith.divf %156, %157 : vector<2x32xf32>
    %159 = vector.extract_strided_slice %141 {offsets = [0, 64], sizes = [2, 32], strides = [1, 1]} : vector<2x96xf32> to vector<2x32xf32>
    %160 = vector.extract_strided_slice %142 {offsets = [0, 64], sizes = [2, 32], strides = [1, 1]} : vector<2x96xf32> to vector<2x32xf32>
    %161 = vector.broadcast %7 : vector<1x32xf32> to vector<2x32xf32>
    %162 = arith.addf %160, %161 : vector<2x32xf32>
    %163 = arith.mulf %150, %162 : vector<2x32xf32>
    %164 = arith.addf %159, %163 : vector<2x32xf32>
    %165 = math.tanh %164 : vector<2x32xf32>
    %cst_38 = arith.constant 1.000000e+00 : f32
    %166 = vector.broadcast %cst_38 : f32 to vector<2x32xf32>
    %167 = arith.subf %166, %158 : vector<2x32xf32>
    %168 = arith.mulf %167, %165 : vector<2x32xf32>
    %169 = arith.mulf %158, %137 : vector<2x32xf32>
    %170 = arith.addf %168, %169 : vector<2x32xf32>
    %c0_39 = arith.constant 0 : index
    %c4 = arith.constant 4 : index
    %c0_40 = arith.constant 0 : index
    %171 = vector.load %arg9[%c0_39, %c4, %c0_40] : memref<2x8x32xf32, #tpu.memory_space<vmem>>, vector<2x1x32xf32>
    %172 = vector.shape_cast %171 : vector<2x1x32xf32> to vector<2x32xf32>
    %173 = vector.shape_cast %170 : vector<2x32xf32> to vector<2x1x32xf32>
    tpu.vector_store %arg9[%c0_39, %c4, %c0_40], %173 {strides = array<i32>} : memref<2x8x32xf32, #tpu.memory_space<vmem>>, vector<2x1x32xf32>,
    %174 = vector.extract_strided_slice %5 {offsets = [10, 0], sizes = [2, 96], strides = [1, 1]} : vector<16x96xf32> to vector<2x96xf32>
    %cst_41 = arith.constant dense<0.000000e+00> : vector<2x96xf32>
    %175 = tpu.matmul %170, %6, %cst_41 {dimension_numbers = #tpu.dot_dimension_numbers<[1], [0], [0], [1], [0, 0, 1, 1], [], []>} : vector<2x32xf32>, vector<32x96xf32>, vector<2x96xf32> -> vector<2x96xf32>
    %176 = vector.extract_strided_slice %174 {offsets = [0, 0], sizes = [2, 32], strides = [1, 1]} : vector<2x96xf32> to vector<2x32xf32>
    %177 = vector.extract_strided_slice %175 {offsets = [0, 0], sizes = [2, 32], strides = [1, 1]} : vector<2x96xf32> to vector<2x32xf32>
    %178 = arith.addf %176, %177 : vector<2x32xf32>
    %179 = arith.negf %178 : vector<2x32xf32>
    %180 = math.exp %179 : vector<2x32xf32>
    %cst_42 = arith.constant 1.000000e+00 : f32
    %181 = vector.broadcast %cst_42 : f32 to vector<2x32xf32>
    %182 = arith.addf %181, %180 : vector<2x32xf32>
    %183 = arith.divf %181, %182 : vector<2x32xf32>
    %184 = vector.extract_strided_slice %174 {offsets = [0, 32], sizes = [2, 32], strides = [1, 1]} : vector<2x96xf32> to vector<2x32xf32>
    %185 = vector.extract_strided_slice %175 {offsets = [0, 32], sizes = [2, 32], strides = [1, 1]} : vector<2x96xf32> to vector<2x32xf32>
    %186 = arith.addf %184, %185 : vector<2x32xf32>
    %187 = arith.negf %186 : vector<2x32xf32>
    %188 = math.exp %187 : vector<2x32xf32>
    %cst_43 = arith.constant 1.000000e+00 : f32
    %189 = vector.broadcast %cst_43 : f32 to vector<2x32xf32>
    %190 = arith.addf %189, %188 : vector<2x32xf32>
    %191 = arith.divf %189, %190 : vector<2x32xf32>
    %192 = vector.extract_strided_slice %174 {offsets = [0, 64], sizes = [2, 32], strides = [1, 1]} : vector<2x96xf32> to vector<2x32xf32>
    %193 = vector.extract_strided_slice %175 {offsets = [0, 64], sizes = [2, 32], strides = [1, 1]} : vector<2x96xf32> to vector<2x32xf32>
    %194 = vector.broadcast %7 : vector<1x32xf32> to vector<2x32xf32>
    %195 = arith.addf %193, %194 : vector<2x32xf32>
    %196 = arith.mulf %183, %195 : vector<2x32xf32>
    %197 = arith.addf %192, %196 : vector<2x32xf32>
    %198 = math.tanh %197 : vector<2x32xf32>
    %cst_44 = arith.constant 1.000000e+00 : f32
    %199 = vector.broadcast %cst_44 : f32 to vector<2x32xf32>
    %200 = arith.subf %199, %191 : vector<2x32xf32>
    %201 = arith.mulf %200, %198 : vector<2x32xf32>
    %202 = arith.mulf %191, %170 : vector<2x32xf32>
    %203 = arith.addf %201, %202 : vector<2x32xf32>
    %c0_45 = arith.constant 0 : index
    %c5 = arith.constant 5 : index
    %c0_46 = arith.constant 0 : index
    %204 = vector.load %arg9[%c0_45, %c5, %c0_46] : memref<2x8x32xf32, #tpu.memory_space<vmem>>, vector<2x1x32xf32>
    %205 = vector.shape_cast %204 : vector<2x1x32xf32> to vector<2x32xf32>
    %206 = vector.shape_cast %203 : vector<2x32xf32> to vector<2x1x32xf32>
    tpu.vector_store %arg9[%c0_45, %c5, %c0_46], %206 {strides = array<i32>} : memref<2x8x32xf32, #tpu.memory_space<vmem>>, vector<2x1x32xf32>,
    %207 = vector.extract_strided_slice %5 {offsets = [12, 0], sizes = [2, 96], strides = [1, 1]} : vector<16x96xf32> to vector<2x96xf32>
    %cst_47 = arith.constant dense<0.000000e+00> : vector<2x96xf32>
    %208 = tpu.matmul %203, %6, %cst_47 {dimension_numbers = #tpu.dot_dimension_numbers<[1], [0], [0], [1], [0, 0, 1, 1], [], []>} : vector<2x32xf32>, vector<32x96xf32>, vector<2x96xf32> -> vector<2x96xf32>
    %209 = vector.extract_strided_slice %207 {offsets = [0, 0], sizes = [2, 32], strides = [1, 1]} : vector<2x96xf32> to vector<2x32xf32>
    %210 = vector.extract_strided_slice %208 {offsets = [0, 0], sizes = [2, 32], strides = [1, 1]} : vector<2x96xf32> to vector<2x32xf32>
    %211 = arith.addf %209, %210 : vector<2x32xf32>
    %212 = arith.negf %211 : vector<2x32xf32>
    %213 = math.exp %212 : vector<2x32xf32>
    %cst_48 = arith.constant 1.000000e+00 : f32
    %214 = vector.broadcast %cst_48 : f32 to vector<2x32xf32>
    %215 = arith.addf %214, %213 : vector<2x32xf32>
    %216 = arith.divf %214, %215 : vector<2x32xf32>
    %217 = vector.extract_strided_slice %207 {offsets = [0, 32], sizes = [2, 32], strides = [1, 1]} : vector<2x96xf32> to vector<2x32xf32>
    %218 = vector.extract_strided_slice %208 {offsets = [0, 32], sizes = [2, 32], strides = [1, 1]} : vector<2x96xf32> to vector<2x32xf32>
    %219 = arith.addf %217, %218 : vector<2x32xf32>
    %220 = arith.negf %219 : vector<2x32xf32>
    %221 = math.exp %220 : vector<2x32xf32>
    %cst_49 = arith.constant 1.000000e+00 : f32
    %222 = vector.broadcast %cst_49 : f32 to vector<2x32xf32>
    %223 = arith.addf %222, %221 : vector<2x32xf32>
    %224 = arith.divf %222, %223 : vector<2x32xf32>
    %225 = vector.extract_strided_slice %207 {offsets = [0, 64], sizes = [2, 32], strides = [1, 1]} : vector<2x96xf32> to vector<2x32xf32>
    %226 = vector.extract_strided_slice %208 {offsets = [0, 64], sizes = [2, 32], strides = [1, 1]} : vector<2x96xf32> to vector<2x32xf32>
    %227 = vector.broadcast %7 : vector<1x32xf32> to vector<2x32xf32>
    %228 = arith.addf %226, %227 : vector<2x32xf32>
    %229 = arith.mulf %216, %228 : vector<2x32xf32>
    %230 = arith.addf %225, %229 : vector<2x32xf32>
    %231 = math.tanh %230 : vector<2x32xf32>
    %cst_50 = arith.constant 1.000000e+00 : f32
    %232 = vector.broadcast %cst_50 : f32 to vector<2x32xf32>
    %233 = arith.subf %232, %224 : vector<2x32xf32>
    %234 = arith.mulf %233, %231 : vector<2x32xf32>
    %235 = arith.mulf %224, %203 : vector<2x32xf32>
    %236 = arith.addf %234, %235 : vector<2x32xf32>
    %c0_51 = arith.constant 0 : index
    %c6 = arith.constant 6 : index
    %c0_52 = arith.constant 0 : index
    %237 = vector.load %arg9[%c0_51, %c6, %c0_52] : memref<2x8x32xf32, #tpu.memory_space<vmem>>, vector<2x1x32xf32>
    %238 = vector.shape_cast %237 : vector<2x1x32xf32> to vector<2x32xf32>
    %239 = vector.shape_cast %236 : vector<2x32xf32> to vector<2x1x32xf32>
    tpu.vector_store %arg9[%c0_51, %c6, %c0_52], %239 {strides = array<i32>} : memref<2x8x32xf32, #tpu.memory_space<vmem>>, vector<2x1x32xf32>,
    %240 = vector.extract_strided_slice %5 {offsets = [14, 0], sizes = [2, 96], strides = [1, 1]} : vector<16x96xf32> to vector<2x96xf32>
    %cst_53 = arith.constant dense<0.000000e+00> : vector<2x96xf32>
    %241 = tpu.matmul %236, %6, %cst_53 {dimension_numbers = #tpu.dot_dimension_numbers<[1], [0], [0], [1], [0, 0, 1, 1], [], []>} : vector<2x32xf32>, vector<32x96xf32>, vector<2x96xf32> -> vector<2x96xf32>
    %242 = vector.extract_strided_slice %240 {offsets = [0, 0], sizes = [2, 32], strides = [1, 1]} : vector<2x96xf32> to vector<2x32xf32>
    %243 = vector.extract_strided_slice %241 {offsets = [0, 0], sizes = [2, 32], strides = [1, 1]} : vector<2x96xf32> to vector<2x32xf32>
    %244 = arith.addf %242, %243 : vector<2x32xf32>
    %245 = arith.negf %244 : vector<2x32xf32>
    %246 = math.exp %245 : vector<2x32xf32>
    %cst_54 = arith.constant 1.000000e+00 : f32
    %247 = vector.broadcast %cst_54 : f32 to vector<2x32xf32>
    %248 = arith.addf %247, %246 : vector<2x32xf32>
    %249 = arith.divf %247, %248 : vector<2x32xf32>
    %250 = vector.extract_strided_slice %240 {offsets = [0, 32], sizes = [2, 32], strides = [1, 1]} : vector<2x96xf32> to vector<2x32xf32>
    %251 = vector.extract_strided_slice %241 {offsets = [0, 32], sizes = [2, 32], strides = [1, 1]} : vector<2x96xf32> to vector<2x32xf32>
    %252 = arith.addf %250, %251 : vector<2x32xf32>
    %253 = arith.negf %252 : vector<2x32xf32>
    %254 = math.exp %253 : vector<2x32xf32>
    %cst_55 = arith.constant 1.000000e+00 : f32
    %255 = vector.broadcast %cst_55 : f32 to vector<2x32xf32>
    %256 = arith.addf %255, %254 : vector<2x32xf32>
    %257 = arith.divf %255, %256 : vector<2x32xf32>
    %258 = vector.extract_strided_slice %240 {offsets = [0, 64], sizes = [2, 32], strides = [1, 1]} : vector<2x96xf32> to vector<2x32xf32>
    %259 = vector.extract_strided_slice %241 {offsets = [0, 64], sizes = [2, 32], strides = [1, 1]} : vector<2x96xf32> to vector<2x32xf32>
    %260 = vector.broadcast %7 : vector<1x32xf32> to vector<2x32xf32>
    %261 = arith.addf %259, %260 : vector<2x32xf32>
    %262 = arith.mulf %249, %261 : vector<2x32xf32>
    %263 = arith.addf %258, %262 : vector<2x32xf32>
    %264 = math.tanh %263 : vector<2x32xf32>
    %cst_56 = arith.constant 1.000000e+00 : f32
    %265 = vector.broadcast %cst_56 : f32 to vector<2x32xf32>
    %266 = arith.subf %265, %257 : vector<2x32xf32>
    %267 = arith.mulf %266, %264 : vector<2x32xf32>
    %268 = arith.mulf %257, %236 : vector<2x32xf32>
    %269 = arith.addf %267, %268 : vector<2x32xf32>
    %c0_57 = arith.constant 0 : index
    %c7 = arith.constant 7 : index
    %c0_58 = arith.constant 0 : index
    %270 = vector.load %arg9[%c0_57, %c7, %c0_58] : memref<2x8x32xf32, #tpu.memory_space<vmem>>, vector<2x1x32xf32>
    %271 = vector.shape_cast %270 : vector<2x1x32xf32> to vector<2x32xf32>
    %272 = vector.shape_cast %269 : vector<2x32xf32> to vector<2x1x32xf32>
    tpu.vector_store %arg9[%c0_57, %c7, %c0_58], %272 {strides = array<i32>} : memref<2x8x32xf32, #tpu.memory_space<vmem>>, vector<2x1x32xf32>,
    %c0_59 = arith.constant 0 : index
    %c0_60 = arith.constant 0 : index
    %273 = vector.load %arg5[%c0_59, %c0_60] : memref<32x64xf32, #tpu.memory_space<vmem>>, vector<32x64xf32>
    %cst_61 = arith.constant dense<0.000000e+00> : vector<2x64xf32>
    %274 = tpu.matmul %269, %273, %cst_61 {dimension_numbers = #tpu.dot_dimension_numbers<[1], [0], [0], [1], [0, 0, 1, 1], [], []>} : vector<2x32xf32>, vector<32x64xf32>, vector<2x64xf32> -> vector<2x64xf32>
    %c0_62 = arith.constant 0 : index
    %c0_63 = arith.constant 0 : index
    %275 = vector.load %arg6[%c0_62, %c0_63] : memref<1x64xf32, #tpu.memory_space<vmem>>, vector<1x64xf32>
    %276 = vector.broadcast %275 : vector<1x64xf32> to vector<2x64xf32>
    %277 = arith.addf %274, %276 : vector<2x64xf32>
    %cst_64 = arith.constant 0.000000e+00 : f32
    %278 = vector.broadcast %cst_64 : f32 to vector<2x64xf32>
    %279 = arith.maximumf %277, %278 : vector<2x64xf32>
    %c0_65 = arith.constant 0 : index
    %c0_66 = arith.constant 0 : index
    %280 = vector.load %arg7[%c0_65, %c0_66] : memref<64x4xf32, #tpu.memory_space<vmem>>, vector<64x4xf32>
    %cst_67 = arith.constant dense<0.000000e+00> : vector<2x4xf32>
    %281 = tpu.matmul %279, %280, %cst_67 {dimension_numbers = #tpu.dot_dimension_numbers<[1], [0], [0], [1], [0, 0, 1, 1], [], []>} : vector<2x64xf32>, vector<64x4xf32>, vector<2x4xf32> -> vector<2x4xf32>
    %c0_68 = arith.constant 0 : index
    %c0_69 = arith.constant 0 : index
    %282 = vector.load %arg8[%c0_68, %c0_69] : memref<1x4xf32, #tpu.memory_space<vmem>>, vector<1x4xf32>
    %283 = vector.broadcast %282 : vector<1x4xf32> to vector<2x4xf32>
    %284 = arith.addf %281, %283 : vector<2x4xf32>
    %c0_70 = arith.constant 0 : index
    %c0_71 = arith.constant 0 : index
    %285 = vector.load %arg10[%c0_70, %c0_71] : memref<2x4xf32, #tpu.memory_space<vmem>>, vector<2x4xf32>
    tpu.vector_store %arg10[%c0_70, %c0_71], %284 {strides = array<i32>} : memref<2x4xf32, #tpu.memory_space<vmem>>, vector<2x4xf32>,
    return
  }
}

</mosaic_0001>

<bundles_post_ra>
// kernel: tpu_custom_call.1
= control target key start
LH: loop header
LB: loop body
LE: loop exit
PB: predicated region body
PF: predicated region fallthrough
CT: control target
= control target key end

     0   :  { %16 = vsyncpa [#allocation3], 0  ;;  %vm53_vm0 = vcmask 1043456   ;;  %vm46_vm1 = vcmask 31744   ;;  %v1904_v9 = vmov 0.0|0.0   ;;  %s2339_s0 = inlined_call_operand.vmem [shape: f32[16,4], index: 0, kind: input, shape index: {}]   ;;  %s2340_s1 = inlined_call_operand.vmem [shape: f32[4,96], index: 1, kind: input, shape index: {}]   ;;  %s2341_s2 = inlined_call_operand.vmem [shape: f32[32,96], index: 2, kind: input, shape index: {}]   ;;  %s2342_s3 = inlined_call_operand.vmem [shape: f32[1,96], index: 3, kind: input, shape index: {}]   ;;  %s2343_s4 = inlined_call_operand.vmem [shape: f32[1,32], index: 4, kind: input, shape index: {}]   ;;  %s2344_s5 = inlined_call_operand.vmem [shape: f32[32,64], index: 5, kind: input, shape index: {}]   ;;  %s2345_s6 = inlined_call_operand.vmem [shape: f32[1,64], index: 6, kind: input, shape index: {}]   ;;  %s2346_s7 = inlined_call_operand.vmem [shape: f32[64,4], index: 7, kind: input, shape index: {}]   ;;  %s2347_s8 = inlined_call_operand.vmem [shape: f32[1,4], index: 8, kind: input, shape index: {}]   ;;  %s2348_s9 = inlined_call_operand.hbm [shape: f32[2,8,32], index: 9, kind: output, shape index: {0}]   ;;  %s2349_s10 = inlined_call_operand.hbm [shape: f32[2,4], index: 10, kind: output, shape index: {1}]  }
   0x1   :  { %v38_v0 = vld [vmem:[%s2340_s1] sm:$0xf]  ;;  %v37_v2 = vld [vmem:[%s2339_s0 + $0x8] sm:$0xff]  ;;  %v134_v5 = vld [vmem:[%s2341_s2 + $0x10] sm:$0xff]  ;;  %1738 = vmatprep.subr.bf16.mxu0 %v1904_v9 }
   0x2   :  { %v36_v1 = vld [vmem:[%s2339_s0] sm:$0xff]  ;;  %1609 = vmatprep.subr.msk.mxu1 %vm53_vm0, %v38_v0  ;;  %v133_v4 = vld [vmem:[%s2341_s2 + $0x8] sm:$0xff]  ;;  %v135_v7 = vld [vmem:[%s2341_s2 + $0x18] sm:$0xff] }
   0x3   :  { %1611 = vmatprep.mubr.msk.f32.mxu1 %vm46_vm1, %v36_v1  ;;  %v132_v3 = vld [vmem:[%s2341_s2] sm:$0xff]  ;;  %1610 = vmatpush3.msk.msra.mxu1 %vm53_vm0, %v38_v0 }
   0x4   :  { %v1987_v6 = vpack.c.bf16 %v133_v4, %v132_v3  ;;  %v1533_v8 = vld [vmem:[%s2343_s4] ss:$0 sm:$0xff] }
   0x5   :  { %17 = vsyncpa [#allocation5], 0  ;;  %1612 = vmatmul.mubr.msk.f32.vlgmr.msra.gmra.mrb[0].mxu1 %vm46_vm1, %v37_v2  ;;  %1732 = vmatprep.subr.bf16.mxu1 %v1904_v9  ;;  %v1998_v10 = vpack.c.bf16 %v135_v7, %v134_v5  ;;  %vm1905_vm2 = vmmov 0   ;;  %v1906_v11 = vmov 0.0   ;;  %s1907_s2 = smov 64   ;;  %vm137_vm3 = vcmask 261120  }
   0x6   :  { %1734 = vmatpush3.bf16.msra.mxu1 %v1987_v6  ;;  %1622 = vmatprep.mubr.msk.f32.mxu1 %vm1905_vm2, %v1906_v11  ;;  %v1528_v12 = vld [vmem:[%s2342_s3] ss:$0 sm:$0xff]  ;;  %s1908_s3 = smov 96   ;;  %vm283_vm4 = vcmask 253952   ;;  %vm1422_vm5 = vcmask 523264   ;;  %s1910_s28 = smov [#allocation2]  }
   0x7   :  { %1735 = vmatprep.subr.bf16.mxu1 %v1904_v9  ;;  %223 = vrot.lane.b32.xlu0 %v1533_v8, %s1907_s2  ;;  %s1503_s29 = sshll.u32 %s1910_s28, 4  ;;  %s1504_s29 = int_to_ptr.vmem [resolvable:$true] %s1503_s29 }
   0x8   :  { %1740 = vmatpush3.bf16.msra.mxu0 %v1987_v6  ;;  %1633 = vmatprep.mubr.msk.f32.mxu0 %vm1905_vm2, %v1906_v11  ;;  %s1856_s30 = scalar_lea.vmem %s1504_s29, 256  ;;  %p1861_p1 = scmp.lt.s32.totalorder %s1504_s29, %s1504_s29 }
   0x9   :  { %1741 = vmatprep.subr.bf16.mxu0 %v1904_v9  ;;  %p1857_p0 = scmp.ne.s32.totalorder %s1504_s29, %s1856_s30  ;;  %p1862_p2 = scmp.lt.s32.totalorder %s1856_s30, %s1856_s30 }
   0xa   :  { %1737 = vmatpush3.bf16.msra.mxu1 %v1998_v10 }
   0xb   :  { %1744 = vmatprep.subr.bf16.mxu1 %v1904_v9  ;;  %p1863_p3 = por %p1862_p2, %p1861_p1 }
   0xc   :  { %1743 = vmatpush3.bf16.msra.mxu0 %v1998_v10 }
   0xd   :  { %1623 = vmatmul.mubr.f32.vlgmr.msra.gmra.mrb[2].mxu1 %v1906_v11  ;;  %1750 = vmatprep.subr.bf16.mxu0 %v1904_v9  ;;  %p1864_p4 = pnand %p1863_p3, %p1857_p0 }
   0xe   :  { %1746 = vmatpush3.bf16.msra.mxu1 %v1987_v6  ;;  %1644 = vmatprep.mubr.msk.f32.mxu1 %vm1905_vm2, %v1906_v11 }
   0xf   :  { %1747 = vmatprep.subr.bf16.mxu1 %v1904_v9 }
  0x12   :  { %1749 = vmatpush3.bf16.msra.mxu1 %v1998_v10 }
  0x13   :  { %1756 = vmatprep.subr.bf16.mxu1 %v1904_v9 }
  0x79   :  { %v2024_v16 = vpop.permute.xlu0 %223 }
  0xd8   :  { %v1613_v13 = vpop.f32.mrb[0].mxu1 }
  0xd9   :  { %v2022_v14 = vadd.f32 %v1613_v13, %v1528_v12  ;;  %v123_v15 = vpop.f32.mrb[1].mxu1 }
  0xda   :  { %v2028_v20 = vadd.f32 %v1528_v12, %v123_v15 }
  0xe0   :  { %v207_v17 = vpop.f32.mrb[2].mxu1 }
  0xe1   :  { %v226_v18 = vadd.f32 %v2024_v16, %v207_v17  ;;  %v1624_v19 = vpop.f32.mrb[3].mxu1  ;;  %v211_v21 = vadd.f32 %v207_v17, %v2028_v20 }
  0xe3   :  { %228 = vrot.lane.b32.xlu0 %v226_v18, %s1907_s2  ;;  %v1532_v22 = vmul.f32 -1.442695, %v211_v21 }
  0xe5   :  { %1808 = vpow2.f32 %v1532_v22 }
  0xef   :  { %v1809_v23 = vpop.eup %1808 }
  0xf0   :  { %v215_v24 = vadd.f32 1.0, %v1809_v23 }
  0xf2   :  { %1810 = vrcp.f32 %v215_v24 }
  0xfc   :  { %v1811_v25 = vpop.eup %1810 }
  0xfd   :  { %v238_v31 = vsub.f32 1.0, %v1811_v25  ;;  %v244_v33 = vmul.f32 0.0, %v1811_v25 }
 0x155   :  { %v229_v26 = vpop.permute.xlu0 %228 }
 0x156   :  { %v231_v27 = vmul.f32 %v1811_v25, %v229_v26 }
 0x158   :  { %233 = vrot.lane.b32.xlu1 %v231_v27, %s1907_s2 }
 0x1ca   :  { %v234_v28 = vpop.permute.xlu1 %233 }
 0x1cb   :  { %v236_v29 = vadd.f32 %v234_v28, %v2028_v20 }
 0x1cd   :  { %1812 = vtanh.f32 %v236_v29 }
 0x1d7   :  { %v1813_v30 = vpop.eup %1812 }
 0x1d8   :  { %240 = vrot.lane.b32.xlu1 %v1813_v30, %s1908_s3 }
 0x24a   :  { %v241_v32 = vpop.permute.xlu1 %240 }
 0x24b   :  { %v243_v34 = vmul.f32 %v241_v32, %v238_v31 }
 0x24d   :  { %v2034_v35 = vadd.f32 %v244_v33, %v243_v34 }
 0x24f   :  { %286 = vrot.lane.b32.xlu0 %v2034_v35, %s1908_s3  ;;  %v389_v53 = vrot.slane %v2034_v35, 6 }
 0x2c1   :  { %v287_v36 = vpop.permute.xlu0 %286 }
 0x2c2   :  { %1634 = vmatmul.mubr.msk.f32.vlgmr.msra.gmra.mrb[0].mxu0 %vm137_vm3, %v287_v36 }
 0x2c3   :  { %1752 = vmatpush3.bf16.msra.mxu0 %v1987_v6  ;;  %1655 = vmatprep.mubr.msk.f32.mxu0 %vm1905_vm2, %v1906_v11 }
 0x2c4   :  { %1753 = vmatprep.subr.bf16.mxu0 %v1904_v9 }
 0x2c7   :  { %1755 = vmatpush3.bf16.msra.mxu0 %v1998_v10 }
 0x2c8   :  { %1762 = vmatprep.subr.bf16.mxu0 %v1904_v9 }
 0x395   :  { %v356_v37 = vpop.f32.mrb[0].mxu0 }
 0x396   :  { %v370_v38 = vadd.f32 %v356_v37, %v2024_v16  ;;  %v1635_v39 = vpop.f32.mrb[1].mxu0  ;;  %v361_v41 = vrot.slane %v356_v37, 6 }
 0x398   :  { %v372_v40 = vrot.slane %v370_v38, 6  ;;  %v363_v42 = vadd.f32 %v361_v41, %v2028_v20 }
 0x39a   :  { %373 = vrot.lane.b32.xlu1 %v372_v40, %s1907_s2  ;;  %v1535_v43 = vmul.f32 -1.442695, %v363_v42 }
 0x39c   :  { %1814 = vpow2.f32 %v1535_v43 }
 0x3a6   :  { %v1815_v44 = vpop.eup %1814 }
 0x3a7   :  { %v367_v45 = vadd.f32 1.0, %v1815_v44 }
 0x3a9   :  { %1816 = vrcp.f32 %v367_v45 }
 0x3b3   :  { %v1817_v46 = vpop.eup %1816 }
 0x3b4   :  { %v383_v52 = vsub.f32 1.0, %v1817_v46  ;;  %v391_v56 = vmul.f32 %v1817_v46, %v389_v53 }
 0x40c   :  { %v374_v47 = vpop.permute.xlu1 %373 }
 0x40d   :  { %v376_v48 = vmul.f32 %v1817_v46, %v374_v47 }
 0x40f   :  { %378 = vrot.lane.b32.xlu0 %v376_v48, %s1907_s2 }
 0x481   :  { %v379_v49 = vpop.permute.xlu0 %378 }
 0x482   :  { %v381_v50 = vadd.f32 %v379_v49, %v2028_v20 }
 0x484   :  { %1818 = vtanh.f32 %v381_v50 }
 0x48e   :  { %v1819_v51 = vpop.eup %1818 }
 0x48f   :  { %385 = vrot.lane.b32.xlu1 %v1819_v51, %s1908_s3 }
 0x501   :  { %v386_v54 = vpop.permute.xlu1 %385 }
 0x502   :  { %v388_v55 = vmul.f32 %v386_v54, %v383_v52 }
 0x504   :  { %v2052_v57 = vadd.f32 %v391_v56, %v388_v55 }
 0x506   :  { %v434_v58 = vrot.slane %v2052_v57, 2  ;;  %v538_v18 = vrot.slane %v2052_v57, 6 }
 0x508   :  { %435 = vrot.lane.b32.xlu0 %v434_v58, %s1908_s3 }
 0x57a   :  { %v436_v59 = vpop.permute.xlu0 %435 }
 0x57b   :  { %1645 = vmatmul.mubr.msk.f32.vlgmr.msra.gmra.mrb[4].mxu1 %vm137_vm3, %v436_v59 }
 0x57c   :  { %1758 = vmatpush3.bf16.msra.mxu1 %v1987_v6  ;;  %1666 = vmatprep.mubr.msk.f32.mxu1 %vm1905_vm2, %v1906_v11 }
 0x57d   :  { %1759 = vmatprep.subr.bf16.mxu1 %v1904_v9 }
 0x580   :  { %1761 = vmatpush3.bf16.msra.mxu1 %v1998_v10 }
 0x581   :  { %1768 = vmatprep.subr.bf16.mxu1 %v1904_v9 }
 0x64e   :  { %v505_v60 = vpop.f32.mrb[4].mxu1 }
 0x64f   :  { %v519_v61 = vadd.f32 %v505_v60, %v2024_v16  ;;  %v1646_v62 = vpop.f32.mrb[5].mxu1  ;;  %v510_v0 = vrot.slane %v505_v60, 4 }
 0x651   :  { %v521_v63 = vrot.slane %v519_v61, 4  ;;  %v512_v1 = vadd.f32 %v510_v0, %v2028_v20 }
 0x653   :  { %522 = vrot.lane.b32.xlu1 %v521_v63, %s1907_s2  ;;  %v1537_v2 = vmul.f32 -1.442695, %v512_v1 }
 0x655   :  { %1820 = vpow2.f32 %v1537_v2 }
 0x65f   :  { %v1821_v3 = vpop.eup %1820 }
 0x660   :  { %v516_v4 = vadd.f32 1.0, %v1821_v3 }
 0x662   :  { %1822 = vrcp.f32 %v516_v4 }
 0x66c   :  { %v1823_v5 = vpop.eup %1822 }
 0x66d   :  { %v532_v17 = vsub.f32 1.0, %v1823_v5  ;;  %v540_v21 = vmul.f32 %v1823_v5, %v538_v18 }
 0x6c5   :  { %v523_v7 = vpop.permute.xlu1 %522 }
 0x6c6   :  { %v525_v8 = vmul.f32 %v1823_v5, %v523_v7 }
 0x6c8   :  { %527 = vrot.lane.b32.xlu0 %v525_v8, %s1907_s2 }
 0x73a   :  { %v528_v12 = vpop.permute.xlu0 %527 }
 0x73b   :  { %v530_v13 = vadd.f32 %v528_v12, %v2028_v20 }
 0x73d   :  { %1824 = vtanh.f32 %v530_v13 }
 0x747   :  { %v1825_v15 = vpop.eup %1824 }
 0x748   :  { %534 = vrot.lane.b32.xlu1 %v1825_v15, %s1908_s3 }
 0x7ba   :  { %v535_v19 = vpop.permute.xlu1 %534 }
 0x7bb   :  { %v537_v22 = vmul.f32 %v535_v19, %v532_v17 }
 0x7bd   :  { %v2070_v23 = vadd.f32 %v540_v21, %v537_v22 }
 0x7bf   :  { %v582_v24 = vrot.slane %v2070_v23, 4  ;;  %v686_v43 = vrot.slane %v2070_v23, 6 }
 0x7c1   :  { %583 = vrot.lane.b32.xlu0 %v582_v24, %s1908_s3 }
 0x833   :  { %v584_v25 = vpop.permute.xlu0 %583 }
 0x834   :  { %1656 = vmatmul.mubr.msk.f32.vlgmr.msra.gmra.mrb[2].mxu0 %vm137_vm3, %v584_v25 }
 0x835   :  { %1764 = vmatpush3.bf16.msra.mxu0 %v1987_v6  ;;  %1677 = vmatprep.mubr.msk.f32.mxu0 %vm1905_vm2, %v1906_v11 }
 0x836   :  { %1765 = vmatprep.subr.bf16.mxu0 %v1904_v9 }
 0x839   :  { %1767 = vmatpush3.bf16.msra.mxu0 %v1998_v10 }
 0x83a   :  { %1774 = vmatprep.subr.bf16.mxu0 %v1904_v9 }
 0x907   :  { %v653_v26 = vpop.f32.mrb[2].mxu0 }
 0x908   :  { %v667_v27 = vadd.f32 %v653_v26, %v2024_v16  ;;  %v1657_v28 = vpop.f32.mrb[3].mxu0  ;;  %v658_v30 = vrot.slane %v653_v26, 2 }
 0x90a   :  { %v669_v29 = vrot.slane %v667_v27, 2  ;;  %v660_v31 = vadd.f32 %v658_v30, %v2028_v20 }
 0x90c   :  { %670 = vrot.lane.b32.xlu1 %v669_v29, %s1907_s2  ;;  %v1539_v32 = vmul.f32 -1.442695, %v660_v31 }
 0x90e   :  { %1826 = vpow2.f32 %v1539_v32 }
 0x918   :  { %v1827_v33 = vpop.eup %1826 }
 0x919   :  { %v664_v34 = vadd.f32 1.0, %v1827_v33 }
 0x91b   :  { %1828 = vrcp.f32 %v664_v34 }
 0x925   :  { %v1829_v36 = vpop.eup %1828 }
 0x926   :  { %v680_v42 = vsub.f32 1.0, %v1829_v36  ;;  %v688_v45 = vmul.f32 %v1829_v36, %v686_v43 }
 0x97e   :  { %v671_v37 = vpop.permute.xlu1 %670 }
 0x97f   :  { %v673_v38 = vmul.f32 %v1829_v36, %v671_v37 }
 0x981   :  { %675 = vrot.lane.b32.xlu0 %v673_v38, %s1907_s2 }
 0x9f3   :  { %v676_v39 = vpop.permute.xlu0 %675 }
 0x9f4   :  { %v678_v40 = vadd.f32 %v676_v39, %v2028_v20 }
 0x9f6   :  { %1830 = vtanh.f32 %v678_v40 }
 0xa00   :  { %v1831_v41 = vpop.eup %1830 }
 0xa01   :  { %682 = vrot.lane.b32.xlu1 %v1831_v41, %s1908_s3 }
 0xa73   :  { %v683_v44 = vpop.permute.xlu1 %682 }
 0xa74   :  { %v685_v46 = vmul.f32 %v683_v44, %v680_v42 }
 0xa76   :  { %v2088_v47 = vadd.f32 %v688_v45, %v685_v46 }
 0xa78   :  { %v732_v48 = vrot.slane %v2088_v47, 6 }
 0xa7a   :  { %733 = vrot.lane.b32.xlu0 %v732_v48, %s1908_s3 }
 0xaec   :  { %v734_v49 = vpop.permute.xlu0 %733 }
 0xaed   :  { %1667 = vmatmul.mubr.msk.f32.vlgmr.msra.gmra.mrb[6].mxu1 %vm137_vm3, %v734_v49 }
 0xaee   :  { %1770 = vmatpush3.bf16.msra.mxu1 %v1987_v6  ;;  %1688 = vmatprep.mubr.msk.f32.mxu1 %vm1905_vm2, %v1906_v11 }
 0xaef   :  { %1771 = vmatprep.subr.bf16.mxu1 %v1904_v9 }
 0xaf2   :  { %1773 = vmatpush3.bf16.msra.mxu1 %v1998_v10 }
 0xaf3   :  { %1780 = vmatprep.subr.bf16.mxu1 %v1904_v9 }
 0xbc0   :  { %v803_v20 = vpop.f32.mrb[6].mxu1 }
 0xbc1   :  { %v814_v50 = vadd.f32 %v803_v20, %v2024_v16  ;;  %v1668_v51 = vpop.f32.mrb[7].mxu1  ;;  %v807_v52 = vadd.f32 %v803_v20, %v2022_v14 }
 0xbc3   :  { %816 = vrot.lane.b32.xlu1 %v814_v50, %s1907_s2  ;;  %v1541_v53 = vmul.f32 -1.442695, %v807_v52 }
 0xbc5   :  { %1832 = vpow2.f32 %v1541_v53 }
 0xbcf   :  { %v1833_v54 = vpop.eup %1832 }
 0xbd0   :  { %v811_v55 = vadd.f32 1.0, %v1833_v54 }
 0xbd2   :  { %1834 = vrcp.f32 %v811_v55 }
 0xbdc   :  { %v1835_v56 = vpop.eup %1834 }
 0xbdd   :  { %v826_v63 = vsub.f32 1.0, %v1835_v56  ;;  %v833_v1 = vmul.f32 %v1835_v56, %v732_v48 }
 0xc35   :  { %v817_v58 = vpop.permute.xlu1 %816 }
 0xc36   :  { %v819_v59 = vmul.f32 %v1835_v56, %v817_v58 }
 0xc38   :  { %821 = vrot.lane.b32.xlu0 %v819_v59, %s1907_s2 }
 0xcaa   :  { %v822_v60 = vpop.permute.xlu0 %821 }
 0xcab   :  { %v824_v61 = vadd.f32 %v822_v60, %v2022_v14 }
 0xcad   :  { %1836 = vtanh.f32 %v824_v61 }
 0xcb7   :  { %v1837_v62 = vpop.eup %1836 }
 0xcb8   :  { %828 = vrot.lane.b32.xlu1 %v1837_v62, %s1908_s3 }
 0xd2a   :  { %v829_v0 = vpop.permute.xlu1 %828 }
 0xd2b   :  { %v831_v2 = vmul.f32 %v829_v0, %v826_v63 }
 0xd2d   :  { %v2105_v3 = vadd.f32 %v833_v1, %v831_v2 }
 0xd2f   :  { %874 = vrot.lane.b32.xlu0 %v2105_v3, %s1908_s3  ;;  %v977_v27 = vrot.slane %v2105_v3, 6 }
 0xda1   :  { %v875_v4 = vpop.permute.xlu0 %874 }
 0xda2   :  { %1678 = vmatmul.mubr.msk.f32.vlgmr.msra.gmra.mrb[4].mxu0 %vm137_vm3, %v875_v4 }
 0xda3   :  { %1776 = vmatpush3.bf16.msra.mxu0 %v1987_v6  ;;  %1699 = vmatprep.mubr.msk.f32.mxu0 %vm1905_vm2, %v1906_v11 }
 0xda4   :  { %1777 = vmatprep.subr.bf16.mxu0 %v1904_v9 }
 0xda7   :  { %1779 = vmatpush3.bf16.msra.mxu0 %v1998_v10 }
 0xda8   :  { %1786 = vmatprep.subr.bf16.mxu0 %v1904_v9 }
 0xe75   :  { %v944_v5 = vpop.f32.mrb[4].mxu0 }
 0xe76   :  { %v958_v7 = vadd.f32 %v944_v5, %v2024_v16  ;;  %v1679_v8 = vpop.f32.mrb[5].mxu0  ;;  %v949_v13 = vrot.slane %v944_v5, 6 }
 0xe78   :  { %v960_v12 = vrot.slane %v958_v7, 6  ;;  %v951_v15 = vadd.f32 %v949_v13, %v2022_v14 }
 0xe7a   :  { %961 = vrot.lane.b32.xlu1 %v960_v12, %s1907_s2  ;;  %v1543_v6 = vmul.f32 -1.442695, %v951_v15  ;;  %v250_v12 = vlaneseq }
 0xe7c   :  { %1838 = vpow2.f32 %v1543_v6  ;;  %v251_v15 = vshrl.u32 %v250_v12, 7 }
 0xe86   :  { %v1839_v17 = vpop.eup %1838 }
 0xe87   :  { %v955_v18 = vadd.f32 1.0, %v1839_v17 }
 0xe89   :  { %1840 = vrcp.f32 %v955_v18 }
 0xe93   :  { %v1841_v19 = vpop.eup %1840 }
 0xe94   :  { %v971_v26 = vsub.f32 1.0, %v1841_v19  ;;  %v979_v30 = vmul.f32 %v1841_v19, %v977_v27 }
 0xeec   :  { %v962_v21 = vpop.permute.xlu1 %961 }
 0xeed   :  { %v964_v10 = vmul.f32 %v1841_v19, %v962_v21 }
 0xeef   :  { %966 = vrot.lane.b32.xlu0 %v964_v10, %s1907_s2  ;;  %v2158_v10 = vsub.s32 0, %v251_v15 }
 0xf61   :  { %v967_v22 = vpop.permute.xlu0 %966 }
 0xf62   :  { %v969_v24 = vadd.f32 %v967_v22, %v2022_v14  ;;  %v543_v22 = vcombine.high %v2070_v23, %v2070_v23 }
 0xf64   :  { %1842 = vtanh.f32 %v969_v24  ;;  %v691_v24 = vcombine.high %v2088_v47, %v2088_v47 }
 0xf6e   :  { %v1843_v25 = vpop.eup %1842 }
 0xf6f   :  { %973 = vrot.lane.b32.xlu1 %v1843_v25, %s1908_s3 }
 0xfe1   :  { %v974_v28 = vpop.permute.xlu1 %973 }
 0xfe2   :  { %v976_v29 = vmul.f32 %v974_v28, %v971_v26 }
 0xfe4   :  { %v2123_v31 = vadd.f32 %v979_v30, %v976_v29 }
 0xfe6   :  { %v1022_v32 = vrot.slane %v2123_v31, 2  ;;  %v1126_v51 = vrot.slane %v2123_v31, 6 }
 0xfe8   :  { %1023 = vrot.lane.b32.xlu0 %v1022_v32, %s1908_s3 }
0x105a   :  { %v1024_v33 = vpop.permute.xlu0 %1023 }
0x105b   :  { %1689 = vmatmul.mubr.msk.f32.vlgmr.msra.gmra.mrb[8].mxu1 %vm137_vm3, %v1024_v33 }
0x105c   :  { %1710 = vmatprep.mubr.msk.f32.mxu1 %vm1905_vm2, %v1906_v11 }
0x112e   :  { %v1093_v34 = vpop.f32.mrb[8].mxu1 }
0x112f   :  { %v1107_v36 = vadd.f32 %v1093_v34, %v2024_v16  ;;  %v1690_v37 = vpop.f32.mrb[9].mxu1  ;;  %v1098_v39 = vrot.slane %v1093_v34, 4 }
0x1131   :  { %v1109_v38 = vrot.slane %v1107_v36, 4  ;;  %v1100_v40 = vadd.f32 %v1098_v39, %v2022_v14 }
0x1133   :  { %1110 = vrot.lane.b32.xlu1 %v1109_v38, %s1907_s2  ;;  %v1545_v41 = vmul.f32 -1.442695, %v1100_v40 }
0x1135   :  { %1844 = vpow2.f32 %v1545_v41 }
0x113f   :  { %v1845_v42 = vpop.eup %1844 }
0x1140   :  { %v1104_v43 = vadd.f32 1.0, %v1845_v42 }
0x1142   :  { %1846 = vrcp.f32 %v1104_v43  ;;  %v1320_v43 = vld [vmem:[%s2344_s5] sm:$0xff] }
0x114c   :  { %v1847_v44 = vpop.eup %1846 }
0x114d   :  { %v1120_v50 = vsub.f32 1.0, %v1847_v44  ;;  %v1128_v53 = vmul.f32 %v1847_v44, %v1126_v51 }
0x11a5   :  { %v1111_v45 = vpop.permute.xlu1 %1110 }
0x11a6   :  { %v1113_v46 = vmul.f32 %v1847_v44, %v1111_v45  ;;  %v1321_v44 = vld [vmem:[%s2344_s5 + $0x8] sm:$0xff]  ;;  %v1322_v45 = vld [vmem:[%s2344_s5 + $0x10] sm:$0xff] }
0x11a8   :  { %1115 = vrot.lane.b32.xlu0 %v1113_v46, %s1907_s2 }
0x121a   :  { %v1116_v48 = vpop.permute.xlu0 %1115 }
0x121b   :  { %v1118_v49 = vadd.f32 %v1116_v48, %v2022_v14  ;;  %v1781_v48 = vpack.c.bf16 %v1321_v44, %v1320_v43 }
0x121d   :  { %1848 = vtanh.f32 %v1118_v49  ;;  %v1323_v49 = vld [vmem:[%s2344_s5 + $0x18] sm:$0xff]  ;;  %1782 = vmatpush3.bf16.msra.mxu1 %v1781_v48 }
0x121e   :  { %1783 = vmatprep.subr.bf16.mxu1 %v1904_v9 }
0x1227   :  { %v1849_v20 = vpop.eup %1848 }
0x1228   :  { %1122 = vrot.lane.b32.xlu1 %v1849_v20, %s1908_s3  ;;  %v1784_v20 = vpack.c.bf16 %v1323_v49, %v1322_v45 }
0x122a   :  { %1785 = vmatpush3.bf16.msra.mxu1 %v1784_v20 }
0x129a   :  { %v1123_v52 = vpop.permute.xlu1 %1122 }
0x129b   :  { %v1125_v54 = vmul.f32 %v1123_v52, %v1120_v50 }
0x129d   :  { %v2137_v55 = vadd.f32 %v1128_v53, %v1125_v54 }
0x129f   :  { %v1170_v56 = vrot.slane %v2137_v55, 4  ;;  %v1131_v36 = vcombine.high %v2137_v55, %v2137_v55  ;;  %v1274_v51 = vrot.slane %v2137_v55, 6 }
0x12a1   :  { %1171 = vrot.lane.b32.xlu0 %v1170_v56, %s1908_s3 }
0x1313   :  { %v1172_v58 = vpop.permute.xlu0 %1171 }
0x1314   :  { %1700 = vmatmul.mubr.msk.f32.vlgmr.msra.gmra.mrb[6].mxu0 %vm137_vm3, %v1172_v58 }
0x1315   :  { %1729 = vmatprep.mubr.msk.f32.mxu0 %vm1905_vm2, %v1906_v11 }
0x13e7   :  { %v1241_v59 = vpop.f32.mrb[6].mxu0 }
0x13e8   :  { %v1255_v60 = vadd.f32 %v1241_v59, %v2024_v16  ;;  %v1701_v61 = vpop.f32.mrb[7].mxu0  ;;  %v1246_v63 = vrot.slane %v1241_v59, 2  ;;  %v1909_v16 = vmov 1966171168  }
0x13e9   :  { %v248_v8 = vunpack.c.l.s4 %v1909_v16 }
0x13ea   :  { %v1257_v62 = vrot.slane %v1255_v60, 2  ;;  %v1248_v0 = vadd.f32 %v1246_v63, %v2022_v14 }
0x13eb   :  { %v249_v13 = vunpack.c.0.s8 %v248_v8 }
0x13ec   :  { %1258 = vrot.lane.b32.xlu1 %v1257_v62, %s1907_s2  ;;  %v1547_v1 = vmul.f32 -1.442695, %v1248_v0 }
0x13ed   :  { %v2152_v18 = vsub.s32 %v249_v13, %v251_v15 }
0x13ee   :  { %1850 = vpow2.f32 %v1547_v1 }
0x13ef   :  { %v253_v19 = vrot.slane %v2034_v35, %v2152_v18  ;;  %v400_v21 = vrot.slane %v2052_v57, %v2152_v18  ;;  %v2168_v35 = vrot.slane %v691_v24, %v2152_v18  ;;  %v2172_v28 = vrot.slane %v543_v22, %v2152_v18 }
0x13f0   :  { %v2183_v30 = vrot.slane %v2105_v3, %v2152_v18  ;;  %v2187_v32 = vrot.slane %v2123_v31, %v2152_v18  ;;  %v2201_v40 = vrot.slane %v1131_v36, %v2152_v18 }
0x13f1   :  { %v261_v25 = vrot.slane %v253_v19, %v2152_v18  ;;  %v558_v47 = vrot.slane %v2172_v28, %v2152_v18  ;;  %v706_v29 = vrot.slane %v2168_v35, %v2152_v18  ;;  %v254_v53 = vcombine.high %v253_v19, %v253_v19 }
0x13f2   :  { %v850_v38 = vrot.slane %v2183_v30, %v2152_v18  ;;  %v996_v3 = vrot.slane %v2187_v32, %v2152_v18  ;;  %v1146_v42 = vrot.slane %v2201_v40, %v2152_v18  ;;  %v401_v58 = vcombine.high %v400_v21, %v400_v21 }
0x13f3   :  { %v272_v57 = vrot.slane %v261_v25, %v2158_v10  ;;  %v569_v33 = vrot.slane %v558_v47, %v2158_v10  ;;  %v714_v34 = vcombine.high %v706_v29, %v706_v29  ;;  %v268_v61 = vrot.slane %v254_v53, %v2152_v18  ;;  %v1407_v29 = vld [vmem:[%s2346_s7] sm:$0xff]  ;;  %v1414_v53 = vld [vmem:[%s2346_s7 + $0x38] sm:$0xff] }
0x13f4   :  { %v861_v31 = vrot.slane %v850_v38, %v2158_v10  ;;  %v1004_v39 = vcombine.high %v996_v3, %v996_v3  ;;  %v1157_v46 = vrot.slane %v1146_v42, %v2158_v10  ;;  %v415_v0 = vrot.slane %v401_v58, %v2152_v18 }
0x13f5   :  { %v719_v37 = vrot.slane %v714_v34, %v2158_v10  ;;  %v843_v22 = vcombine.high %v2183_v30, %v2183_v30  ;;  %v989_v24 = vcombine.high %v2187_v32, %v2187_v32  ;;  %v1408_v30 = vld [vmem:[%s2346_s7 + $0x8] sm:$0xff]  ;;  %v1409_v32 = vld [vmem:[%s2346_s7 + $0x10] sm:$0xff]  ;;  %v1410_v34 = vld [vmem:[%s2346_s7 + $0x18] sm:$0xff] }
0x13f6   :  { %v1009_v41 = vrot.slane %v1004_v39, %v2158_v10  ;;  %v1411_v39 = vld [vmem:[%s2346_s7 + $0x20] sm:$0xff] }
0x13f8   :  { %v1851_v2 = vpop.eup %1850 }
0x13f9   :  { %v1252_v4 = vadd.f32 1.0, %v1851_v2  ;;  %v276_v2 = vrot.slane %v268_v61, %v2158_v10 }
0x13fb   :  { %1852 = vrcp.f32 %v1252_v4 }
0x1405   :  { %v2147_v5 = vpop.eup %1852 }
0x1406   :  { %v1268_v50 = vsub.f32 1.0, %v2147_v5  ;;  %v1276_v54 = vmul.f32 %v2147_v5, %v1274_v51 }
0x145e   :  { %v1259_v7 = vpop.permute.xlu1 %1258 }
0x145f   :  { %v1261_v11 = vmul.f32 %v2147_v5, %v1259_v7  ;;  %v417_v5 = vcombine.high %v415_v0, %v415_v0  ;;  %v551_v7 = vcombine.high %v2172_v28, %v2172_v28 }
0x1461   :  { %1263 = vrot.lane.b32.xlu0 %v1261_v11, %s1907_s2  ;;  %v699_v11 = vcombine.high %v2168_v35, %v2168_v35  ;;  %v425_v13 = vrot.slane %v417_v5, %v2158_v10  ;;  %v565_v15 = vrot.slane %v551_v7, %v2152_v18  ;;  %v1003_v35 = vrot.slane %v989_v24, %v2152_v18 }
0x1463   :  { %v573_v19 = vrot.slane %v565_v15, %v2158_v10  ;;  %v1005_v28 = vcombine.high %v1003_v35, %v1003_v35 }
0x14d3   :  { %v1264_v6 = vpop.permute.xlu0 %1263 }
0x14d4   :  { %v1266_v17 = vadd.f32 %v1264_v6, %v2022_v14  ;;  %v408_v14 = vrot.slane %v400_v21, %v2152_v18  ;;  %v713_v6 = vrot.slane %v699_v11, %v2152_v18 }
0x14d6   :  { %1854 = vtanh.f32 %v1266_v17  ;;  %v416_v27 = vcombine.high %v408_v14, %v408_v14  ;;  %v715_v21 = vcombine.high %v713_v6, %v713_v6 }
0x14d8   :  { %v421_v23 = vrot.slane %v416_v27, %v2158_v10  ;;  %v723_v14 = vrot.slane %v715_v21, %v2158_v10 }
0x14e0   :  { %v1855_v26 = vpop.eup %1854 }
0x14e1   :  { %1270 = vrot.lane.b32.xlu1 %v1855_v26, %s1908_s3  ;;  %v857_v26 = vrot.slane %v843_v22, %v2152_v18 }
0x14e3   :  { %v865_v27 = vrot.slane %v857_v26, %v2158_v10 }
0x14e5   :  { %277 = vrot.lane.b32.xlu1 %v272_v57, %s1908_s3 }
0x14e9   :  { %426 = vrot.lane.b32.xlu1 %v421_v23, %s1908_s3  ;;  %v1139_v23 = vcombine.high %v2201_v40, %v2201_v40  ;;  %v1412_v40 = vld [vmem:[%s2346_s7 + $0x28] sm:$0xff] }
0x14ea   :  { %v1793_v43 = vpack.c.bf16 %v1412_v40, %v1411_v39 }
0x14eb   :  { %v1153_v38 = vrot.slane %v1139_v23, %v2152_v18 }
0x14ed   :  { %574 = vrot.lane.b32.xlu1 %v569_v33, %s1908_s3  ;;  %v1787_v33 = vpack.c.bf16 %v1408_v30, %v1407_v29 }
0x14ef   :  { %1788 = vmatpush3.bf16.msra.mxu0 %v1787_v33 }
0x14f0   :  { %1789 = vmatprep.subr.bf16.mxu0 %v1904_v9 }
0x14f1   :  { %724 = vrot.lane.b32.xlu1 %v719_v37, %s1908_s3  ;;  %v1013_v37 = vrot.slane %v1005_v28, %v2158_v10 }
0x14f5   :  { %866 = vrot.lane.b32.xlu1 %v861_v31, %s1908_s3  ;;  %v1790_v31 = vpack.c.bf16 %v1410_v34, %v1409_v32 }
0x14f7   :  { %1791 = vmatpush3.bf16.msra.mxu0 %v1790_v31 }
0x14f8   :  { %1792 = vmatprep.subr.bf16.mxu0 %v1904_v9 }
0x14f9   :  { %1014 = vrot.lane.b32.xlu1 %v1009_v41, %s1908_s3  ;;  %v1161_v41 = vrot.slane %v1153_v38, %v2158_v10 }
0x14fb   :  { %1794 = vmatpush3.bf16.msra.mxu0 %v1793_v43 }
0x14fc   :  { %1795 = vmatprep.subr.bf16.mxu0 %v1904_v9 }
0x14fd   :  { %1162 = vrot.lane.b32.xlu1 %v1157_v46, %s1908_s3 }
0x1553   :  { %v1271_v52 = vpop.permute.xlu1 %1270 }
0x1554   :  { %v1273_v56 = vmul.f32 %v1271_v52, %v1268_v50  ;;  %v1413_v52 = vld [vmem:[%s2346_s7 + $0x30] sm:$0xff] }
0x1556   :  { %v1277_v59 = vadd.f32 %v1276_v54, %v1273_v56  ;;  %v1796_v54 = vpack.c.bf16 %v1414_v53, %v1413_v52  ;;  %v1548_v56 = vld [vmem:[%s2345_s6] ss:$0 sm:$0xff] }
0x1557   :  { %v278_v60 = vpop.permute.xlu1 %277 }
0x1558   :  { %v1279_v62 = vcombine.high %v1277_v59, %v1277_v59  ;;  %284 = vst.msk [vmem:[#allocation2] sm:$0x1] %vm283_vm4, %v278_v60  ;;  %v1331_v63 = vrot.slane %v1277_v59, 6  ;;  %1797 = vmatpush3.bf16.msra.mxu0 %v1796_v54 }
0x155a   :  { %v1286_v1 = vrot.slane %v1279_v62, %v2152_v18  ;;  %1332 = vrot.lane.b32.xlu0 %v1331_v63, %s1908_s3 }
0x155b   :  { %v427_v55 = vpop.permute.xlu1 %426 }
0x155c   :  { %432 = vst.msk [vmem:[#allocation2 + $0x1] sm:$0x1] %vm283_vm4, %v427_v55  ;;  %v1294_v4 = vrot.slane %v1286_v1, %v2152_v18  ;;  %v1287_v47 = vcombine.high %v1286_v1, %v1286_v1 }
0x155e   :  { %279 = vrot.lane.b32.xlu0 %v276_v2, %s1908_s3  ;;  %v1302_v16 = vcombine.high %v1294_v4, %v1294_v4  ;;  %v1301_v3 = vrot.slane %v1287_v47, %v2152_v18 }
0x155f   :  { %v575_v8 = vpop.permute.xlu1 %574 }
0x1560   :  { %580 = vst.msk [vmem:[#allocation2 + $0x2] sm:$0x1] %vm283_vm4, %v575_v8  ;;  %v1307_v12 = vrot.slane %v1302_v16, %v2158_v10  ;;  %v1303_v42 = vcombine.high %v1301_v3, %v1301_v3 }
0x1562   :  { %1312 = vrot.lane.b32.xlu1 %v1307_v12, %s1908_s3  ;;  %428 = vrot.lane.b32.xlu0 %v425_v13, %s1908_s3  ;;  %v1311_v18 = vrot.slane %v1303_v42, %v2158_v10 }
0x1563   :  { %v725_v17 = vpop.permute.xlu1 %724 }
0x1564   :  { %730 = vst.msk [vmem:[#allocation2 + $0x3] sm:$0x1] %vm283_vm4, %v725_v17 }
0x1566   :  { %576 = vrot.lane.b32.xlu0 %v573_v19, %s1908_s3 }
0x1567   :  { %v867_v25 = vpop.permute.xlu1 %866 }
0x1568   :  { %872 = vst.msk [vmem:[#allocation2 + $0x4] sm:$0x1] %vm283_vm4, %v867_v25 }
0x156a   :  { %726 = vrot.lane.b32.xlu0 %v723_v14, %s1908_s3 }
0x156b   :  { %v1015_v57 = vpop.permute.xlu1 %1014 }
0x156c   :  { %1020 = vst.msk [vmem:[#allocation2 + $0x5] sm:$0x1] %vm283_vm4, %v1015_v57 }
0x156e   :  { %868 = vrot.lane.b32.xlu0 %v865_v27, %s1908_s3 }
0x156f   :  { %v1163_v36 = vpop.permute.xlu1 %1162 }
0x1570   :  { %1168 = vst.msk [vmem:[#allocation2 + $0x6] sm:$0x1] %vm283_vm4, %v1163_v36 }
0x1572   :  { %1016 = vrot.lane.b32.xlu0 %v1013_v37, %s1908_s3 }
0x1576   :  { %1164 = vrot.lane.b32.xlu0 %v1161_v41, %s1908_s3 }
0x157a   :  { %1314 = vrot.lane.b32.xlu0 %v1311_v18, %s1908_s3 }
0x15cc   :  { %v1333_v44 = vpop.permute.xlu0 %1332 }
0x15cd   :  { %1711 = vmatmul.mubr.msk.f32.vlgmr.msra.gmra.mrb[10].mxu1 %vm137_vm3, %v1333_v44 }
0x15d0   :  { %v280_v45 = vpop.permute.xlu0 %279 }
0x15d1   :  { %285 = vst.msk [vmem:[#allocation2 + $0x8] sm:$0x1] %vm283_vm4, %v280_v45 }
0x15d4   :  { %v1313_v46 = vpop.permute.xlu1 %1312  ;;  %v429_v48 = vpop.permute.xlu0 %428 }
0x15d5   :  { %1318 = vst.msk [vmem:[#allocation2 + $0x7] sm:$0x1] %vm283_vm4, %v1313_v46  ;;  %433 = vst.msk [vmem:[#allocation2 + $0x9] sm:$0x1] %vm283_vm4, %v429_v48 }
0x15d8   :  { %v577_v49 = vpop.permute.xlu0 %576 }
0x15d9   :  { %581 = vst.msk [vmem:[#allocation2 + $0xa] sm:$0x1] %vm283_vm4, %v577_v49 }
0x15dc   :  { %v727_v10 = vpop.permute.xlu0 %726 }
0x15dd   :  { %731 = vst.msk [vmem:[#allocation2 + $0xb] sm:$0x1] %vm283_vm4, %v727_v10 }
0x15e0   :  { %v869_v9 = vpop.permute.xlu0 %868 }
0x15e1   :  { %873 = vst.msk [vmem:[#allocation2 + $0xc] sm:$0x1] %vm283_vm4, %v869_v9 }
0x15e4   :  { %v1017_v20 = vpop.permute.xlu0 %1016 }
0x15e5   :  { %1021 = vst.msk [vmem:[#allocation2 + $0xd] sm:$0x1] %vm283_vm4, %v1017_v20 }
0x15e8   :  { %v1165_v50 = vpop.permute.xlu0 %1164 }
0x15e9   :  { %1169 = vst.msk [vmem:[#allocation2 + $0xe] sm:$0x1] %vm283_vm4, %v1165_v50 }
0x15ec   :  { %v1315_v51 = vpop.permute.xlu0 %1314 }
0x15ed   :  { %1319 = vst.msk [vmem:[#allocation2 + $0xf] sm:$0x1] %vm283_vm4, %v1315_v51 }
0x16a0   :  { %v1402_v58 = vpop.f32.mrb[10].mxu1 }
0x16a1   :  { %v1403_v59 = vadd.f32 %v1548_v56, %v1402_v58  ;;  %v1712_v60 = vpop.f32.mrb[11].mxu1 }
0x16a3   :  { %v1406_v61 = vmax.f32 %v1403_v59, 0.0 }
0x16a5   :  { %1730 = vmatmul.mubr.msk.f32.vlgmr.msra.gmra.mrb[8].mxu0 %vm1422_vm5, %v1406_v61 }
0x16a6   :  { %1867 = shalt.err (!%p1864_p4)
}
0x16a7   :  { %s1868_s6 = scalar_lea.hbm %s2348_s9, 256 }
0x16a8   :  { %p1869_p5 = scmp.ne.s32.totalorder %s2348_s9, %s1868_s6  ;;  %p1872_p6 = scmp.lt.u32.totalorder %s1868_s6, %s2348_s9 }
0x16aa   :  { %p1874_p7 = pnand %p1872_p6, %p1869_p5 }
0x16ac   :  { %1877 = shalt.err (!%p1874_p7)
}
0x16ad   :  { %s1911_s5 = smov 128   ;;  %s1912_s16 = smov 8   ;;  %v1550_v62 = vld [vmem:[%s2347_s8] ss:$0 sm:$0xff]  ;;  %vm1496_vm6 = vcmask 25600  }
0x16ae   :  { %1509 = dma.vmem_to_hbm [thread:$0]  %s1504_s29, 256, %s2348_s9, [#allocation3], %s1911_s5, %s1911_s5, %s1912_s16  }
0x16af   :  { %s1913_s21 = smov [#allocation4]  }
0x16b0   :  { %s1516_s22 = sshll.u32 %s1913_s21, 4  ;;  %s1517_s22 = int_to_ptr.vmem [resolvable:$true] %s1516_s22 }
0x16b1   :  { %s1878_s1 = scalar_lea.vmem %s1517_s22, 32  ;;  %p1883_p9 = scmp.lt.s32.totalorder %s1517_s22, %s1517_s22 }
0x16b2   :  { %p1879_p8 = scmp.ne.s32.totalorder %s1517_s22, %s1878_s1  ;;  %p1884_p10 = scmp.lt.s32.totalorder %s1878_s1, %s1878_s1 }
0x16b4   :  { %p1885_p11 = por %p1884_p10, %p1883_p9 }
0x16b6   :  { %p1886_p12 = pnand %p1885_p11, %p1879_p8 }
0x1778   :  { %v1492_v63 = vpop.f32.mrb[8].mxu0 }
0x1779   :  { %v1493_v0 = vadd.f32 %v1550_v62, %v1492_v63  ;;  %v1731_v1 = vpop.f32.mrb[9].mxu0 }
0x177b   :  { %1497 = vst.msk [vmem:[#allocation4] sm:$0x3] %vm1496_vm6, %v1493_v0 }
0x177c   :  { %1889 = shalt.err (!%p1886_p12)
}
0x177d   :  { %s1890_s24 = scalar_lea.hbm %s2349_s10, 32 }
0x177e   :  { %p1891_p13 = scmp.ne.s32.totalorder %s2349_s10, %s1890_s24  ;;  %p1894_p0 = scmp.lt.u32.totalorder %s1890_s24, %s2349_s10 }
0x1780   :  { %p1896_p1 = pnand %p1894_p0, %p1891_p13 }
0x1782   :  { %1899 = shalt.err (!%p1896_p1)
}
0x1783   :  { %1519 = dma.vmem_to_hbm [thread:$0]  %s1517_s22, 32, %s2349_s10, [#allocation5]  }
0x1784   :  { %1900 = dma.done.wait [#allocation3], 256  }
0x1785   :  { %1901 = vsyncadd [#allocation3], 4294967040 }
0x1786   :  { %1902 = dma.done.wait [#allocation5], 32  }
0x1787   :  { %1903 = vsyncadd [#allocation5], 4294967264 }
0x1788   :  { %1526 = vsyncpa [#allocation3], 1 }
0x1789   :  { %1527 = vsyncpa [#allocation5], 1 }

</bundles_post_ra>
